<compile_context>
chip_gen: v5e
topology: v5e:2x2
jax: 0.10.0
libtpu: 0.0.40
codegen_flags: <defaults>
</compile_context>

<pallas_src>
import jax
import jax.numpy as jnp
from jax.experimental import pallas as pl
from jax.experimental.pallas import tpu as pltpu

NUM_CLASSES = 5
C_PAD = 128                  # class dim padded to a full lane tile (lane-dense out)
MAX_TM_LINEAR = 512          # batch tile cap, pure-linear path
MAX_TM_CE = 256              # smaller cap for CE path (softmax epilogue vregs)
VMEM_TILE_BUDGET = 24 << 20  # double-buffered x tile + resident W^T must fit here
VMEM_LIMIT = 48 << 20        # <= v7x physical 64 MiB; ample on v5e/v6e


def _round_up(x, m):
    return ((x + m - 1) // m) * m


def _round_down_to(x, m):
    return max(m, (x // m) * m)


def _tile_m(batch, d, max_tm):
    # Full-K layout: W^T (d, C_PAD) bf16 resident, x streamed as (tm, d) bf16
    # blocks (double-buffered by the BlockSpec pipeline). Pick the largest tm
    # (multiple of 16 for clean bf16 sublane packing) that fits the budget.
    wt_bytes = d * C_PAD * 2
    x_row_bytes = d * 2
    fit_tm = _round_down_to(max(VMEM_TILE_BUDGET - wt_bytes, 0) // (2 * x_row_bytes), 16)
    tm = min(max_tm, _round_up(batch, 16), fit_tm)
    b_pad = _round_up(batch, tm)
    return tm, b_pad


def _prep_params(w, b):
    # w: (C, D) PyTorch Linear layout; b: (1, C).
    # Pre-transpose to (D, C_PAD) bf16 so the MXU is fed directly (no in-kernel
    # transpose); bias stays f32. Padded class columns are zero.
    c, d = w.shape
    wt = jnp.zeros((d, C_PAD), jnp.bfloat16).at[:, :c].set(w.T.astype(jnp.bfloat16))
    bp = jnp.zeros((1, C_PAD), jnp.float32).at[:, :c].set(b.astype(jnp.float32))
    return wt, bp


def _prep_x(x, b_pad):
    # Single pass over x: bf16 cast, fused with batch-tail padding only when
    # the batch is not already a tile multiple. No D padding (full-K block).
    batch, d = x.shape
    xb = x.astype(jnp.bfloat16)
    if b_pad == batch:
        return xb
    return jnp.zeros((b_pad, d), jnp.bfloat16).at[:batch].set(xb)


# ------------------------------ kernels ------------------------------------

def _linear_kernel(x_ref, wt_ref, b_ref, out_ref):
    # (tm, D) bf16 @ (D, C_PAD) bf16 -> f32 accumulate on the MXU, fused bias.
    out_ref[...] = (
        jnp.dot(x_ref[...], wt_ref[...], preferred_element_type=jnp.float32)
        + b_ref[...]
    )


def _linear_ce_kernel(x_ref, wt_ref, b_ref, y_ref, loss_ref):
    # Fused linear + cross-entropy; emits this batch tile's partial loss sum.
    logits = (
        jnp.dot(x_ref[...], wt_ref[...], preferred_element_type=jnp.float32)
        + b_ref[...]
    )                                                        # (tm, C_PAD) f32
    tm = logits.shape[0]
    col = jax.lax.broadcasted_iota(jnp.int32, (tm, C_PAD), 1)
    valid_col = col < NUM_CLASSES

    # Softmax over the 5 real classes; padded columns masked out (f32 math).
    masked = jnp.where(valid_col, logits, jnp.float32(-1e30))
    mx = jnp.max(masked, axis=-1, keepdims=True)             # (tm, 1)
    shifted = masked - mx
    expv = jnp.where(valid_col, jnp.exp(shifted), jnp.float32(0.0))
    lse = jnp.log(jnp.sum(expv, axis=-1, keepdims=True))     # (tm, 1)

    # nll = lse - (logit[y] - mx); padded rows carry y = -1 -> zero contribution.
    y_tile = y_ref[...]                                      # (tm, 1) int32
    picked = jnp.sum(jnp.where(col == y_tile, shifted, jnp.float32(0.0)),
                     axis=-1, keepdims=True)                 # (tm, 1)
    nll = jnp.where(y_tile >= 0, lse - picked, jnp.float32(0.0))
    loss_ref[0, 0] = jnp.sum(nll)        # per-tile partial sum (SMEM output)


# ------------------------------ wrappers ------------------------------------

@jax.jit
def linear_forward(x, w, b):
    batch, d = x.shape
    tm, b_pad = _tile_m(batch, d, MAX_TM_LINEAR)
    xp = _prep_x(x, b_pad)
    wt, bp = _prep_params(w, b)

    out = pl.pallas_call(
        _linear_kernel,
        out_shape=jax.ShapeDtypeStruct((b_pad, C_PAD), jnp.float32),
        grid_spec=pltpu.PrefetchScalarGridSpec(
            num_scalar_prefetch=0,
            grid=(b_pad // tm,),
            in_specs=[
                pl.BlockSpec((tm, d), lambda m: (m, 0)),      # x: streamed
                pl.BlockSpec((d, C_PAD), lambda m: (0, 0)),   # W^T: resident
                pl.BlockSpec((1, C_PAD), lambda m: (0, 0)),   # bias: resident
            ],
            out_specs=pl.BlockSpec((tm, C_PAD), lambda m: (m, 0)),
        ),
        compiler_params=pltpu.CompilerParams(
            dimension_semantics=("parallel",),
            vmem_limit_bytes=VMEM_LIMIT,
        ),
    )(xp, wt, bp)
    return out[:batch, :NUM_CLASSES]


@jax.jit
def linear_ce_forward(x, w, b, y):
    batch, d = x.shape
    tm, b_pad = _tile_m(batch, d, MAX_TM_CE)
    xp = _prep_x(x, b_pad)
    wt, bp = _prep_params(w, b)
    yp = jnp.full((b_pad, 1), -1, jnp.int32).at[:batch, 0].set(y.astype(jnp.int32))

    nm = b_pad // tm
    loss_parts = pl.pallas_call(
        _linear_ce_kernel,
        out_shape=jax.ShapeDtypeStruct((nm, 1), jnp.float32),
        grid_spec=pltpu.PrefetchScalarGridSpec(
            num_scalar_prefetch=0,
            grid=(nm,),
            in_specs=[
                pl.BlockSpec((tm, d), lambda m: (m, 0)),      # x: streamed
                pl.BlockSpec((d, C_PAD), lambda m: (0, 0)),   # W^T: resident
                pl.BlockSpec((1, C_PAD), lambda m: (0, 0)),   # bias: resident
                pl.BlockSpec((tm, 1), lambda m: (m, 0)),      # labels (int32)
            ],
            # Per-tile partial sums -> batch axis safely "parallel" (v7x 2 TCs).
            out_specs=pl.BlockSpec((1, 1), lambda m: (m, 0),
                                   memory_space=pltpu.MemorySpace.SMEM),
        ),
        compiler_params=pltpu.CompilerParams(
            dimension_semantics=("parallel",),
            vmem_limit_bytes=VMEM_LIMIT,
        ),
    )(xp, wt, bp, yp)
    return jnp.sum(loss_parts) / batch


class TorchModelPallas:
    """JAX/Pallas mirror of the PyTorch TorchModel."""

    def __init__(self, input_size, key):
        kw, kb = jax.random.split(key)
        bound = 1.0 / (input_size ** 0.5)
        # PyTorch Linear default init: U(-1/sqrt(fan_in), 1/sqrt(fan_in))
        self.w = jax.random.uniform(
            kw, (NUM_CLASSES, input_size), jnp.float32, -bound, bound)
        self.b = jax.random.uniform(
            kb, (1, NUM_CLASSES), jnp.float32, -bound, bound)

    def forward(self, x, y=None):
        if y is None:
            return linear_forward(x, self.w, self.b)
        return linear_ce_forward(x, self.w, self.b, y)


# ------------------------------ main ----------------------------------------

if __name__ == "__main__":
    batch, input_size = 8, 32

    key = jax.random.PRNGKey(0)
    kx, ky, kparam = jax.random.split(key, 3)
    x = jax.random.normal(kx, (batch, input_size), dtype=jnp.float32)
    y = jax.random.randint(ky, (batch,), 0, NUM_CLASSES, dtype=jnp.int32)

    model = TorchModelPallas(input_size, kparam)

    # Inference path: logits (B, 5)
    logits = jax.block_until_ready(model.forward(x))

    # Training path: scalar mean cross-entropy loss
    loss = jax.block_until_ready(model.forward(x, y))

    # Reference 1: same bf16-operand matmul as the kernel (tight tolerance).
    ref_logits_bf = jnp.dot(x.astype(jnp.bfloat16), model.w.T.astype(jnp.bfloat16),
                            preferred_element_type=jnp.float32) + model.b
    ref_logp_bf = jax.nn.log_softmax(ref_logits_bf, axis=-1)
    ref_loss_bf = -jnp.mean(ref_logp_bf[jnp.arange(batch), y])

    # Reference 2: full-f32 PyTorch semantics (loose tolerance vs bf16 matmul).
    ref_logits_f32 = jnp.dot(x, model.w.T,
                             precision=jax.lax.Precision.HIGHEST) + model.b
    ref_logp_f32 = jax.nn.log_softmax(ref_logits_f32, axis=-1)
    ref_loss_f32 = -jnp.mean(ref_logp_f32[jnp.arange(batch), y])

    assert logits.shape == (batch, NUM_CLASSES)
    assert jnp.allclose(logits, ref_logits_bf, atol=1e-3, rtol=1e-3)
    assert jnp.allclose(loss, ref_loss_bf, atol=1e-3, rtol=1e-3)
    assert jnp.allclose(logits, ref_logits_f32, atol=5e-2, rtol=5e-2)
    assert jnp.allclose(loss, ref_loss_f32, atol=5e-2, rtol=5e-2)

    print("KERNEL_OK")
</pallas_src>

<mosaic_0001>
module attributes {stable_mosaic.version = 11 : i64} {
  func.func @_linear_kernel(%arg0: i32, %arg1: memref<16x32xbf16, #tpu.memory_space<vmem>>, %arg2: memref<32x128xbf16, #tpu.memory_space<vmem>>, %arg3: memref<1x128xf32, #tpu.memory_space<vmem>>, %arg4: memref<16x128xf32, #tpu.memory_space<vmem>>) attributes {dimension_semantics = [#tpu.dimension_semantics<parallel>], iteration_bounds = array<i64: 1>, scalar_prefetch = 0 : i64, scratch_operands = 0 : i64, tpu.core_type = #tpu.core_type<tc>, window_params = [{transform_indices = @transform_0, window_bounds = array<i64: 16, 32>}, {pipeline_mode = #tpu.pipeline_mode<synchronous>, transform_indices = @transform_1, window_bounds = array<i64: 32, 128>}, {pipeline_mode = #tpu.pipeline_mode<synchronous>, transform_indices = @transform_2, window_bounds = array<i64: 1, 128>}, {transform_indices = @transform_3, window_bounds = array<i64: 16, 128>}]} {
    %c0 = arith.constant 0 : index
    %c0_0 = arith.constant 0 : index
    %0 = vector.load %arg1[%c0, %c0_0] : memref<16x32xbf16, #tpu.memory_space<vmem>>, vector<16x32xbf16>
    %c0_1 = arith.constant 0 : index
    %c0_2 = arith.constant 0 : index
    %1 = vector.load %arg2[%c0_1, %c0_2] : memref<32x128xbf16, #tpu.memory_space<vmem>>, vector<32x128xbf16>
    %cst = arith.constant dense<0.000000e+00> : vector<16x128xf32>
    %2 = tpu.matmul %0, %1, %cst {dimension_numbers = #tpu.dot_dimension_numbers<[1], [0], [0], [1], [0, 0, 1, 1], [], []>} : vector<16x32xbf16>, vector<32x128xbf16>, vector<16x128xf32> -> vector<16x128xf32>
    %c0_3 = arith.constant 0 : index
    %c0_4 = arith.constant 0 : index
    %3 = vector.load %arg3[%c0_3, %c0_4] : memref<1x128xf32, #tpu.memory_space<vmem>>, vector<1x128xf32>
    %4 = vector.broadcast %3 : vector<1x128xf32> to vector<16x128xf32>
    %5 = arith.addf %2, %4 : vector<16x128xf32>
    %c0_5 = arith.constant 0 : index
    %c0_6 = arith.constant 0 : index
    %6 = vector.load %arg4[%c0_5, %c0_6] : memref<16x128xf32, #tpu.memory_space<vmem>>, vector<16x128xf32>
    tpu.vector_store %arg4[%c0_5, %c0_6], %5 {strides = array<i32>} : memref<16x128xf32, #tpu.memory_space<vmem>>, vector<16x128xf32>,
    return
  }
  func.func @transform_0(%arg0: i32) -> (i32, i32) {
    %c0_i32 = arith.constant 0 : i32
    %c0_i32_0 = arith.constant 0 : i32
    return %arg0, %c0_i32 : i32, i32
  }
  func.func @transform_1(%arg0: i32) -> (i32, i32) {
    %c0_i32 = arith.constant 0 : i32
    %c0_i32_0 = arith.constant 0 : i32
    %c0_i32_1 = arith.constant 0 : i32
    return %c0_i32, %c0_i32_0 : i32, i32
  }
  func.func @transform_2(%arg0: i32) -> (i32, i32) {
    %c0_i32 = arith.constant 0 : i32
    %c0_i32_0 = arith.constant 0 : i32
    %c0_i32_1 = arith.constant 0 : i32
    return %c0_i32, %c0_i32_0 : i32, i32
  }
  func.func @transform_3(%arg0: i32) -> (i32, i32) {
    %c0_i32 = arith.constant 0 : i32
    %c0_i32_0 = arith.constant 0 : i32
    return %arg0, %c0_i32 : i32, i32
  }
}

</mosaic_0001>

<bundles_post_ra>
// kernel: linear_forward.1
= control target key start
LH: loop header
LB: loop body
LE: loop exit
PB: predicated region body
PF: predicated region fallthrough
CT: control target
= control target key end

     0   :  { %vm42_vm0 = vcmask 261120   ;;  %s121_s1 = inlined_call_operand.vmem [shape: bf16[32,128], index: 1, kind: input, shape index: {}]   ;;  %s122_s2 = inlined_call_operand.vmem [shape: f32[1,128], index: 2, kind: input, shape index: {}]   ;;  %s123_s0 = inlined_call_operand.vmem [shape: bf16[16,32], index: 0, kind: input, shape index: {}]   ;;  %s124_s3 = inlined_call_operand.vmem [shape: f32[16,128], index: 3, kind: output, shape index: {}]  }
   0x1   :  { %v81_v0 = vld [vmem:[%s121_s1 + $0x8] sm:$0xff]  ;;  %v80_v1 = vld [vmem:[%s121_s1] sm:$0xff] }
   0x2   :  { %52 = vmatpush.bf16.msra.mxu0 %v81_v0  ;;  %v79_v2 = vld [vmem:[%s123_s0] sm:$0xff] }
   0x3   :  { %v82_v3 = vld [vmem:[%s122_s2] ss:$0 sm:$0xff] }
   0x6   :  { %53 = vmatpush.bf16.msra.mxu0 %v80_v1 }
   0x9   :  { %78 = vmatmul.msk.bf16.vlgmr.msra.gmra.mxu0 %vm42_vm0, %v79_v2 }
  0x86   :  { %v55_v4 = vpop.f32.mrf.mxu0 }
  0x87   :  { %v56_v5 = vadd.f32 %v82_v3, %v55_v4 }
  0x89   :  { %60 = vst [vmem:[%s124_s3] sm:$0xff] %v56_v5 }
  0x8e   :  { %v57_v6 = vpop.f32.mrf.mxu0 }
  0x8f   :  { %v58_v7 = vadd.f32 %v82_v3, %v57_v6 }
  0x91   :  { %61 = vst [vmem:[%s124_s3 + $0x8] sm:$0xff] %v58_v7 }

</bundles_post_ra>
